<compile_context>
chip_gen: v7x
topology: tpu7x:2x2x1
jax: 0.10.0
libtpu: 0.0.40
codegen_flags: <defaults>
</compile_context>

<pallas_src>
import functools

import jax
import jax.numpy as jnp
from jax.experimental import pallas as pl
from jax.experimental.pallas import tpu as pltpu

MARGIN = 2.0
EPS = 1e-6  # F.pairwise_distance default eps (added to the difference, as in PyTorch)


def _contrastive_loss_kernel(x1_ref, x2_ref, label_ref, out_ref, acc_ref, *,
                             batch, block_b, margin):
    i = pl.program_id(0)

    # Init the running sum on the first batch tile.
    @pl.when(i == 0)
    def _init():
        acc_ref[...] = jnp.zeros_like(acc_ref)

    x1 = x1_ref[...].astype(jnp.float32)
    x2 = x2_ref[...].astype(jnp.float32)
    diff = x1 - x2 + EPS
    d2 = jnp.sum(diff * diff, axis=-1, keepdims=True)          # (TB, 1) squared distance
    d = jnp.sqrt(d2)                                            # euclidean distance
    label = label_ref[...].astype(jnp.float32)                  # (TB, 1)

    pos_term = (1.0 - label) * d2                               # reuse d2: no sqrt->square
    neg_term = label * jnp.square(jnp.maximum(margin - d, 0.0))
    loss = pos_term + neg_term                                  # (TB, 1)

    # Mask padded tail rows so they do not contribute to the mean.
    row = i * block_b + jax.lax.broadcasted_iota(jnp.int32, loss.shape, 0)
    loss = jnp.where(row < batch, loss, 0.0)

    acc_ref[...] += jnp.sum(loss, keepdims=True)                # (1, 1) running sum

    # Finalize: divide by the true batch size and emit the scalar.
    @pl.when(i == pl.num_programs(0) - 1)
    def _finalize():
        out_ref[...] = acc_ref[...] / batch


def _choose_block_b(batch, feat_dim, itemsize):
    """Pick a batch-tile size: multiple of 8, <= 1024 rows, <= ~2 MiB per input tile."""
    max_rows = max(8, (2 * 1024 * 1024) // max(1, feat_dim * itemsize))
    tb = min(1024, max_rows)
    tb = max(8, (tb // 8) * 8)
    b_pad8 = ((batch + 7) // 8) * 8   # no point tiling larger than the (padded) batch
    return max(8, min(tb, b_pad8))


def contrastive_loss(output1, output2, label, margin=MARGIN, block_b=None):
    """output1, output2: (B, D); label: (B, 1). Returns scalar loss (float32)."""
    B, D = output1.shape
    assert output2.shape == (B, D)
    assert label.shape == (B, 1)

    itemsize = jnp.dtype(output1.dtype).itemsize
    if block_b is None:
        tb = _choose_block_b(B, D, itemsize)
    else:
        tb = int(block_b)
        assert tb % 8 == 0, "block_b must be a multiple of 8 (f32 sublane)"

    num_blocks = pl.cdiv(B, tb)
    b_pad = num_blocks * tb

    # Zero-pad ragged tail; padded rows are additionally masked inside the kernel.
    if b_pad != B:
        pad = ((0, b_pad - B), (0, 0))
        output1 = jnp.pad(output1, pad)
        output2 = jnp.pad(output2, pad)
        label = jnp.pad(label, pad)

    kernel = functools.partial(
        _contrastive_loss_kernel, batch=B, block_b=tb, margin=float(margin))

    cost = pl.CostEstimate(
        flops=int(3 * B * D + 8 * B),
        transcendentals=int(B),                              # one sqrt per row
        bytes_accessed=int(2 * B * D * itemsize
                           + B * jnp.dtype(label.dtype).itemsize + 4),
    )

    out = pl.pallas_call(
        kernel,
        out_shape=jax.ShapeDtypeStruct((1, 1), jnp.float32),
        grid_spec=pltpu.PrefetchScalarGridSpec(
            num_scalar_prefetch=0,
            grid=(num_blocks,),
            in_specs=[
                pl.BlockSpec((tb, D), lambda i: (i, 0)),
                pl.BlockSpec((tb, D), lambda i: (i, 0)),
                pl.BlockSpec((tb, 1), lambda i: (i, 0)),
            ],
            out_specs=pl.BlockSpec((1, 1), lambda i: (0, 0)),
            scratch_shapes=[pltpu.VMEM((1, 1), jnp.float32)],
        ),
        compiler_params=pltpu.CompilerParams(
            # Output block is resident across the batch axis (accumulator) -> arbitrary.
            dimension_semantics=("arbitrary",),
            # Safe on all generations; avoids v5e's 16 MiB scoped default being the limiter.
            vmem_limit_bytes=32 * 1024 * 1024,
        ),
        cost_estimate=cost,
    )(output1, output2, label)
    return out[0, 0]


def _reference(output1, output2, label, margin=MARGIN):
    # Pure-JAX reference matching torch semantics.
    diff = output1 - output2 + EPS
    d = jnp.sqrt(jnp.sum(diff * diff, axis=-1, keepdims=True))
    loss = (1.0 - label) * d**2 + label * jnp.maximum(margin - d, 0.0) ** 2
    return jnp.mean(loss)


if __name__ == "__main__":
    key = jax.random.PRNGKey(0)

    # Test 1: small single-block case (matches the module's typical (B, D) + (B, 1) inputs).
    k1, k2, k3, k4, k5, k6 = jax.random.split(key, 6)
    B, D = 8, 32
    output1 = jax.random.normal(k1, (B, D), dtype=jnp.float32)
    output2 = jax.random.normal(k2, (B, D), dtype=jnp.float32)
    label = jax.random.bernoulli(k3, 0.5, (B, 1)).astype(jnp.float32)

    loss = contrastive_loss(output1, output2, label)
    jax.block_until_ready(loss)
    ref = _reference(output1, output2, label)
    assert jnp.allclose(loss, ref, atol=1e-5, rtol=1e-5), (loss, ref)

    # Test 2: multi-block grid with a ragged (masked + padded) tail block.
    B2, D2 = 20, 32
    o1b = jax.random.normal(k4, (B2, D2), dtype=jnp.float32)
    o2b = jax.random.normal(k5, (B2, D2), dtype=jnp.float32)
    lb = jax.random.bernoulli(k6, 0.5, (B2, 1)).astype(jnp.float32)

    loss2 = contrastive_loss(o1b, o2b, lb, block_b=8)  # grid = 3 blocks, last one ragged
    jax.block_until_ready(loss2)
    ref2 = _reference(o1b, o2b, lb)
    assert jnp.allclose(loss2, ref2, atol=1e-5, rtol=1e-5), (loss2, ref2)

    print("KERNEL_OK")
</pallas_src>

<mosaic_0001>
module attributes {stable_mosaic.version = 11 : i64} {
  func.func @_contrastive_loss_kernel(%arg0: i32, %arg1: memref<8x32xf32, #tpu.memory_space<vmem>>, %arg2: memref<8x32xf32, #tpu.memory_space<vmem>>, %arg3: memref<8x1xf32, #tpu.memory_space<vmem>>, %arg4: memref<1x1xf32, #tpu.memory_space<vmem>>, %arg5: memref<1x1xf32, #tpu.memory_space<vmem>>) attributes {dimension_semantics = [#tpu.dimension_semantics<arbitrary>], iteration_bounds = array<i64: 1>, scalar_prefetch = 0 : i64, scratch_operands = 1 : i64, tpu.core_type = #tpu.core_type<tc>, window_params = [{transform_indices = @transform_0, window_bounds = array<i64: 8, 32>}, {transform_indices = @transform_1, window_bounds = array<i64: 8, 32>}, {transform_indices = @transform_2, window_bounds = array<i64: 8, 1>}, {pipeline_mode = #tpu.pipeline_mode<synchronous>, transform_indices = @transform_3, window_bounds = array<i64: 1, 1>}]} {
    %c0_i32 = arith.constant 0 : i32
    %0 = arith.cmpi eq, %arg0, %c0_i32 : i32
    %1 = arith.extui %0 : i1 to i32
    %c0_i32_0 = arith.constant 0 : i32
    %2 = arith.cmpi ne, %1, %c0_i32_0 : i32
    scf.if %2 {
      %cst_19 = arith.constant 0.000000e+00 : f32
      %42 = vector.broadcast %cst_19 : f32 to vector<1x1xf32>
      %c0_20 = arith.constant 0 : index
      %c0_21 = arith.constant 0 : index
      %43 = vector.load %arg5[%c0_20, %c0_21] : memref<1x1xf32, #tpu.memory_space<vmem>>, vector<1x1xf32>
      tpu.vector_store %arg5[%c0_20, %c0_21], %42 {strides = array<i32>} : memref<1x1xf32, #tpu.memory_space<vmem>>, vector<1x1xf32>,
    } else {
    }
    %c0 = arith.constant 0 : index
    %c0_1 = arith.constant 0 : index
    %3 = vector.load %arg1[%c0, %c0_1] : memref<8x32xf32, #tpu.memory_space<vmem>>, vector<8x32xf32>
    %c0_2 = arith.constant 0 : index
    %c0_3 = arith.constant 0 : index
    %4 = vector.load %arg2[%c0_2, %c0_3] : memref<8x32xf32, #tpu.memory_space<vmem>>, vector<8x32xf32>
    %5 = arith.subf %3, %4 : vector<8x32xf32>
    %cst = arith.constant 9.99999997E-7 : f32
    %6 = vector.broadcast %cst : f32 to vector<8x32xf32>
    %7 = arith.addf %5, %6 : vector<8x32xf32>
    %8 = arith.mulf %7, %7 : vector<8x32xf32>
    %cst_4 = arith.constant dense<0.000000e+00> : vector<8xf32>
    %9 = vector.multi_reduction <add>, %8, %cst_4 [1] : vector<8x32xf32> to vector<8xf32>
    %10 = vector.shape_cast %9 : vector<8xf32> to vector<8x1xf32>
    %11 = math.sqrt %10 : vector<8x1xf32>
    %c0_5 = arith.constant 0 : index
    %c0_6 = arith.constant 0 : index
    %12 = vector.load %arg3[%c0_5, %c0_6] : memref<8x1xf32, #tpu.memory_space<vmem>>, vector<8x1xf32>
    %cst_7 = arith.constant 1.000000e+00 : f32
    %13 = vector.broadcast %cst_7 : f32 to vector<8x1xf32>
    %14 = arith.subf %13, %12 : vector<8x1xf32>
    %15 = arith.mulf %14, %10 : vector<8x1xf32>
    %cst_8 = arith.constant 2.000000e+00 : f32
    %16 = vector.broadcast %cst_8 : f32 to vector<8x1xf32>
    %17 = arith.subf %16, %11 : vector<8x1xf32>
    %cst_9 = arith.constant 0.000000e+00 : f32
    %18 = vector.broadcast %cst_9 : f32 to vector<8x1xf32>
    %19 = arith.maximumf %17, %18 : vector<8x1xf32>
    %20 = arith.mulf %19, %19 : vector<8x1xf32>
    %21 = arith.mulf %12, %20 : vector<8x1xf32>
    %22 = arith.addf %15, %21 : vector<8x1xf32>
    %c8_i32 = arith.constant 8 : i32
    %23 = arith.muli %arg0, %c8_i32 : i32
    %24 = tpu.iota {dimensions = array<i32: 0>} : vector<8x1xi32>
    %25 = vector.broadcast %23 : i32 to vector<8x1xi32>
    %26 = arith.addi %25, %24 : vector<8x1xi32>
    %c8_i32_10 = arith.constant 8 : i32
    %27 = vector.broadcast %c8_i32_10 : i32 to vector<8x1xi32>
    %28 = arith.cmpi slt, %26, %27 : vector<8x1xi32>
    %cst_11 = arith.constant 0.000000e+00 : f32
    %29 = vector.broadcast %cst_11 : f32 to vector<8x1xf32>
    %30 = arith.select %28, %22, %29 : vector<8x1xi1>, vector<8x1xf32>
    %c0_12 = arith.constant 0 : index
    %c0_13 = arith.constant 0 : index
    %31 = vector.load %arg5[%c0_12, %c0_13] : memref<1x1xf32, #tpu.memory_space<vmem>>, vector<1x1xf32>
    %32 = vector.shape_cast %30 : vector<8x1xf32> to vector<1x8x1xf32>
    %cst_14 = arith.constant dense<0.000000e+00> : vector<1xf32>
    %33 = vector.multi_reduction <add>, %32, %cst_14 [1, 2] : vector<1x8x1xf32> to vector<1xf32>
    %34 = vector.shape_cast %33 : vector<1xf32> to vector<1x1x1xf32>
    %35 = vector.extract %34[0, 0, 0] : f32 from vector<1x1x1xf32>
    %36 = vector.broadcast %35 : f32 to vector<1x1xf32>
    %37 = arith.addf %31, %36 : vector<1x1xf32>
    %c0_15 = arith.constant 0 : index
    %c0_16 = arith.constant 0 : index
    %38 = vector.load %arg5[%c0_15, %c0_16] : memref<1x1xf32, #tpu.memory_space<vmem>>, vector<1x1xf32>
    tpu.vector_store %arg5[%c0_15, %c0_16], %37 {strides = array<i32>} : memref<1x1xf32, #tpu.memory_space<vmem>>, vector<1x1xf32>,
    %c0_i32_17 = arith.constant 0 : i32
    %39 = arith.cmpi eq, %arg0, %c0_i32_17 : i32
    %40 = arith.extui %39 : i1 to i32
    %c0_i32_18 = arith.constant 0 : i32
    %41 = arith.cmpi ne, %40, %c0_i32_18 : i32
    scf.if %41 {
      %c0_19 = arith.constant 0 : index
      %c0_20 = arith.constant 0 : index
      %42 = vector.load %arg5[%c0_19, %c0_20] : memref<1x1xf32, #tpu.memory_space<vmem>>, vector<1x1xf32>
      %cst_21 = arith.constant 8.000000e+00 : f32
      %43 = vector.broadcast %cst_21 : f32 to vector<1x1xf32>
      %44 = arith.divf %42, %43 : vector<1x1xf32>
      %c0_22 = arith.constant 0 : index
      %c0_23 = arith.constant 0 : index
      %45 = vector.load %arg4[%c0_22, %c0_23] : memref<1x1xf32, #tpu.memory_space<vmem>>, vector<1x1xf32>
      tpu.vector_store %arg4[%c0_22, %c0_23], %44 {strides = array<i32>} : memref<1x1xf32, #tpu.memory_space<vmem>>, vector<1x1xf32>,
    } else {
    }
    return
  }
  func.func @transform_0(%arg0: i32) -> (i32, i32) {
    %c0_i32 = arith.constant 0 : i32
    %c0_i32_0 = arith.constant 0 : i32
    return %arg0, %c0_i32 : i32, i32
  }
  func.func @transform_1(%arg0: i32) -> (i32, i32) {
    %c0_i32 = arith.constant 0 : i32
    %c0_i32_0 = arith.constant 0 : i32
    return %arg0, %c0_i32 : i32, i32
  }
  func.func @transform_2(%arg0: i32) -> (i32, i32) {
    %c0_i32 = arith.constant 0 : i32
    %c0_i32_0 = arith.constant 0 : i32
    return %arg0, %c0_i32 : i32, i32
  }
  func.func @transform_3(%arg0: i32) -> (i32, i32) {
    %c0_i32 = arith.constant 0 : i32
    %c0_i32_0 = arith.constant 0 : i32
    %c0_i32_1 = arith.constant 0 : i32
    return %c0_i32, %c0_i32_0 : i32, i32
  }
}

</mosaic_0001>

<bundles_post_ra>
// kernel: tpu_custom_call.1
= control target key start
LH: loop header
LB: loop body
LE: loop exit
PB: predicated region body
PF: predicated region fallthrough
CT: control target
= control target key end

     0   :  { %8 = vsyncpa [#allocation4], 0  ;;  %s213_s0 = inlined_call_operand.vmem [shape: f32[8,32], index: 0, kind: input, shape index: {}]   ;;  %s214_s1 = inlined_call_operand.hbm [shape: f32[8,32], index: 1, kind: input, shape index: {}]   ;;  %s215_s2 = inlined_call_operand.vmem [shape: f32[8,1], index: 2, kind: input, shape index: {}]   ;;  %s216_s3 = inlined_call_operand.hbm [shape: f32[1,1], index: 3, kind: output, shape index: {}]  }
   0x1   :  { %9 = vsyncpa [#allocation5], 0  ;;  %s157_s12 = smov [#allocation3]   ;;  %s109_s16 = scalar_lea.hbm %s214_s1, 128 }
   0x2   :  { %s18_s13 = sshll.u32 %s157_s12, 4  ;;  %p110_p0 = scmp.ne.s32.totalorder %s214_s1, %s109_s16  ;;  %s19_s13 = int_to_ptr.vmem [resolvable:$true] %s18_s13 }
   0x3   :  { %p113_p1 = scmp.lt.u32.totalorder %s109_s16, %s214_s1 }
   0x5   :  { %p115_p2 = pnand %p113_p1, %p110_p0 }
   0x7   :  { %118 = shalt.err (!%p115_p2)
}
   0x8   :  { %s119_s21 = scalar_lea.vmem %s19_s13, 128  ;;  %p124_p4 = scmp.lt.s32.totalorder %s19_s13, %s19_s13 }
   0x9   :  { %p120_p3 = scmp.ne.s32.totalorder %s19_s13, %s119_s21  ;;  %p125_p5 = scmp.lt.s32.totalorder %s119_s21, %s119_s21 }
   0xb   :  { %p126_p6 = por %p125_p5, %p124_p4 }
   0xd   :  { %p127_p7 = pnand %p126_p6, %p120_p3 }
   0xf   :  { %130 = shalt.err (!%p127_p7)
}
  0x10   :  { %21 = dma.hbm_to_vmem [thread:$0]  %s214_s1, 128, %s19_s13, [#allocation4]  }
  0x11   :  { %153 = dma.done.wait [#allocation4], 128  }
  0x12   :  { %154 = vsyncadd [#allocation4], 4294967168  ;;  %v33_v0 = vld [vmem:[%s213_s0] sm:$0xff]  ;;  %vm38_vm0 = vcmask 261120   ;;  %vm65_vm3 = vcmask 7168   ;;  %vm31_vm4 = vcmask 0  }
  0x13   :  { %v34_v1 = vld [vmem:[#allocation3] sm:$0xff]  ;;  %v158_v21 = vmov 0.0  }
  0x14   :  { %v35_v2 = vsub.f32 %v33_v0, %v34_v1  ;;  %v49_v12 = vld [vmem:[%s215_s2] sm:$0xff]  ;;  %32 = vst.msk [vmem:[#allocation2] sm:$0x1] %vm31_vm4, %v158_v21  ;;  %s159_s2 = smov [#allocation6]  }
  0x15   :  { %v50_v14 = vsub.f32 1.0, %v49_v12  ;;  %s93_s27 = sshll.u32 %s159_s2, 4  ;;  %s94_s27 = int_to_ptr.vmem [resolvable:$true] %s93_s27 }
  0x16   :  { %v36_v3 = vadd.f32 1e-06, %v35_v2  ;;  %s131_s28 = scalar_lea.vmem %s94_s27, 16  ;;  %s135_s29 = scalar_lea.vmem %s94_s27, 32 }
  0x17   :  { %p132_p8 = scmp.ne.s32.totalorder %s94_s27, %s131_s28  ;;  %p136_p9 = scmp.lt.s32.totalorder %s94_s27, %s94_s27 }
  0x18   :  { %v37_v4 = vmul.f32 %v36_v3, %v36_v3  ;;  %p137_p10 = scmp.lt.s32.totalorder %s135_s29, %s131_s28 }
  0x1a   :  { %v39_v5 = vsel %vm38_vm0, %v37_v4, 0.0  ;;  %p138_p11 = por %p137_p10, %p136_p9 }
  0x1b   :  { %40 = vadd.xlane.f32.xlu0 %v39_v5  ;;  %v64_v29 = vld [vmem:[#allocation2] sm:$0x1] }
  0x1c   :  { %p139_p12 = pnand %p138_p11, %p132_p8 }
  0xa8   :  { %v41_v6 = vpop.xlane.xlu0 %40 }
  0xa9   :  { %107 = vrsqrt.f32 %v41_v6  ;;  %vm44_vm1 = vcmp.eq.f32.partialorder %v41_v6, inf  ;;  %v47_v9 = vand.u32 2147483648, %v41_v6  ;;  %vm46_vm2 = vcmp.eq.f32.partialorder %v41_v6, 0.0 }
  0xaa   :  { %v51_v17 = vmul.f32 %v50_v14, %v41_v6 }
  0xb3   :  { %v108_v7 = vpop.eup %107 }
  0xb4   :  { %v43_v8 = vmul.f32 %v108_v7, %v41_v6 }
  0xb6   :  { %v45_v10 = vsel %vm44_vm1, %v41_v6, %v43_v8 }
  0xb7   :  { %v48_v11 = vsel %vm46_vm2, %v47_v9, %v45_v10 }
  0xb8   :  { %v52_v13 = vsub.f32 2.0, %v48_v11 }
  0xba   :  { %v53_v15 = vmax.f32 %v52_v13, 0.0 }
  0xbc   :  { %v54_v16 = vmul.f32 %v53_v15, %v53_v15 }
  0xbe   :  { %v55_v18 = vmul.f32 %v54_v16, %v49_v12 }
  0xc0   :  { %v56_v19 = vadd.f32 %v55_v18, %v51_v17 }
  0xc2   :  { %v66_v20 = vsel %vm65_vm3, %v56_v19, 0.0 }
  0xc3   :  { %67 = vadd.xlane.f32.xlu0 %v66_v20 }
 0x150   :  { %v68_v22 = vpop.xlane.xlu0 %67 }
 0x151   :  { %v69_v23 = vrot.slane %v68_v22, 4 }
 0x153   :  { %v70_v24 = vadd.f32 %v69_v23, %v68_v22 }
 0x155   :  { %v71_v25 = vrot.slane %v70_v24, 2 }
 0x157   :  { %v72_v26 = vadd.f32 %v71_v25, %v70_v24 }
 0x159   :  { %v73_v27 = vrot.slane %v72_v26, 1 }
 0x15b   :  { %v74_v28 = vadd.f32 %v73_v27, %v72_v26 }
 0x15d   :  { %102 = vpush %v74_v28 }
 0x18e   :  { %s103_s0 = spop %102 }
 0x18f   :  { %v76_v30 = vstv %s103_s0 }
 0x190   :  { %v77_v31 = vadd.f32 %v76_v30, %v64_v29 }
 0x192   :  { %79 = vst.msk [vmem:[#allocation2] sm:$0x1] %vm31_vm4, %v77_v31 }
 0x199   :  { %v83_v32 = vld [vmem:[#allocation2] sm:$0x1] }
 0x19a   :  { %v85_v33 = vmul.f32 0.125, %v83_v32 }
 0x19c   :  { %86 = vst.msk [vmem:[#allocation6] sm:$0x1] %vm31_vm4, %v85_v33 }
 0x19d   :  { %142 = shalt.err (!%p139_p12)
}
 0x19e   :  { %s143_s5 = scalar_lea.hbm %s216_s3, 16 }
 0x19f   :  { %p144_p13 = scmp.ne.s32.totalorder %s216_s3, %s143_s5  ;;  %p147_p0 = scmp.lt.u32.totalorder %s143_s5, %s216_s3 }
 0x1a1   :  { %p149_p1 = pnand %p147_p0, %p144_p13 }
 0x1a3   :  { %152 = shalt.err (!%p149_p1)
}
 0x1a4   :  { %96 = dma.vmem_to_hbm [thread:$0]  %s94_s27, 16, %s216_s3, [#allocation5]  }
 0x1a5   :  { %155 = dma.done.wait [#allocation5], 16  }
 0x1a6   :  { %156 = vsyncadd [#allocation5], 4294967280 }
 0x1a7   :  { %100 = vsyncpa [#allocation4], 1 }
 0x1a8   :  { %101 = vsyncpa [#allocation5], 1 }

</bundles_post_ra>
